<compile_context>
chip_gen: v5e
topology: v5e:2x2
jax: 0.10.0
libtpu: 0.0.40
codegen_flags: <defaults>
</compile_context>

<pallas_src>
import jax
import jax.numpy as jnp
from jax import lax
from jax.experimental import pallas as pl
from jax.experimental.pallas import tpu as pltpu


# ----------------------------- projection kernel -----------------------------

def _kv_proj_kernel(x_ref,              # VMEM (1, C, TN)   f32
                    wk_ref, bk_ref,     # (Cqp, C) bf16, (Cqp, 1) f32
                    wv_ref, bv_ref,     # (C,   C) bf16, (C,   1) f32
                    k_ref, v_ref):      # VMEM (1, Cqp, TN) bf16, (1, C, TN) bf16
    x_bf = x_ref[0].astype(jnp.bfloat16)                                      # (C, TN)
    k = jnp.dot(wk_ref[...], x_bf, preferred_element_type=jnp.float32) + bk_ref[...]
    v = jnp.dot(wv_ref[...], x_bf, preferred_element_type=jnp.float32) + bv_ref[...]
    k_ref[0] = k.astype(jnp.bfloat16)                                         # (Cqp, TN)
    v_ref[0] = v.astype(jnp.bfloat16)                                         # (C,   TN)


# ------------------------------ attention kernel ------------------------------

def _attn_kernel(gamma_ref,             # SMEM (1,) f32
                 xq_ref,                # VMEM (1, C, TQ)   f32  (q rows of x; also residual)
                 k_ref,                 # VMEM (1, Cqp, TK) bf16 (precomputed K)
                 v_ref,                 # VMEM (1, C, TK)   bf16 (precomputed V)
                 wq_ref, bq_ref,        # (Cqp, C) bf16, (Cqp, 1) f32
                 o_ref,                 # VMEM (1, C, TQ)   f32
                 q_scr,                 # VMEM (Cqp, TQ)    bf16
                 m_scr, l_scr,          # VMEM (1, TQ)      f32
                 acc_scr):              # VMEM (C, TQ)      f32
    ki = pl.program_id(2)

    @pl.when(ki == 0)
    def _init():
        # Project the query tile once per (batch, q-tile); reused for every kv step.
        xq_bf = xq_ref[0].astype(jnp.bfloat16)                                # (C, TQ)
        q = jnp.dot(wq_ref[...], xq_bf,
                    preferred_element_type=jnp.float32) + bq_ref[...]         # (Cqp, TQ)
        q_scr[...] = q.astype(jnp.bfloat16)                                   # lane-dense on TQ
        m_scr[...] = jnp.full_like(m_scr, -jnp.inf)
        l_scr[...] = jnp.zeros_like(l_scr)
        acc_scr[...] = jnp.zeros_like(acc_scr)

    k_bf = k_ref[0]                                                           # (Cqp, TK) bf16
    v_bf = v_ref[0]                                                           # (C,   TK) bf16

    # Scores s[j, i] = k_j . q_i  -> (TK, TQ); contract the (tiny, padded) channel axis.
    s = lax.dot_general(k_bf, q_scr[...],
                        dimension_numbers=(((0,), (0,)), ((), ())),
                        preferred_element_type=jnp.float32)                   # (TK, TQ)

    # Online softmax over the kv axis (sublane reductions; all f32).
    m_new = jnp.maximum(m_scr[...], jnp.max(s, axis=0, keepdims=True))        # (1, TQ)
    alpha = jnp.exp(m_scr[...] - m_new)                                       # (1, TQ)
    p = jnp.exp(s - m_new)                                                    # (TK, TQ)
    l_scr[...] = alpha * l_scr[...] + jnp.sum(p, axis=0, keepdims=True)
    acc_scr[...] = alpha * acc_scr[...] + jnp.dot(
        v_bf, p.astype(jnp.bfloat16), preferred_element_type=jnp.float32)     # (C, TQ)
    m_scr[...] = m_new

    @pl.when(ki == pl.num_programs(2) - 1)
    def _finalize():
        attn = acc_scr[...] * pl.reciprocal(l_scr[...], approx=True)          # (C, TQ)
        o_ref[0] = xq_ref[0] + gamma_ref[0] * attn                            # lane-dense store


# ---------------------------------- wrapper -----------------------------------

def _pick_tile(n, target):
    """Largest multiple-of-128 divisor of n that is <= target (or n itself if n % 128)."""
    if n % 128 != 0:
        return n
    t = max(128, (min(target, n) // 128) * 128)
    while n % t:
        t -= 128
    return t


def self_attention_pallas(x_nchw, params, *, tq=256, tk=1024, tproj=512):
    """x_nchw: (B, C, H, W) float32.  Returns (B, C, H, W) float32."""
    B, C, H, W = x_nchw.shape
    N = H * W
    Cq = params["wq"].shape[1]                     # = C // 8 in the reference module
    Cqp = max(16, ((Cq + 15) // 16) * 16)          # pad q/k channels to bf16 packing (x16)

    tq = _pick_tile(N, tq)
    tk = _pick_tile(N, tk)
    tp = _pick_tile(N, tproj)
    nq, nk, ntp = N // tq, N // tk, N // tp

    f32, bf16 = jnp.float32, jnp.bfloat16
    # NCHW flattened is already (B, C, N): reshape only, no transposes in the wrapper.
    x_bcn = x_nchw.reshape(B, C, N)

    # Zero-padded q/k projections (padded channels contribute exactly 0 to scores).
    wq_p = jnp.zeros((C, Cqp), f32).at[:, :Cq].set(params["wq"])
    wk_p = jnp.zeros((C, Cqp), f32).at[:, :Cq].set(params["wk"])
    bq_p = jnp.zeros((Cqp,), f32).at[:Cq].set(params["bq"])
    bk_p = jnp.zeros((Cqp,), f32).at[:Cq].set(params["bk"])

    wq_t = wq_p.T.astype(bf16)                     # (Cqp, C)
    wk_t = wk_p.T.astype(bf16)                     # (Cqp, C)
    wv_t = params["wv"].T.astype(bf16)             # (C, C)
    bq_col = bq_p.reshape(Cqp, 1)
    bk_col = bk_p.reshape(Cqp, 1)
    bv_col = params["bv"].reshape(C, 1)

    # --- 1) K/V projection, once per batch element (hoisted out of the qi loop). ---
    k_bcn, v_bcn = pl.pallas_call(
        _kv_proj_kernel,
        out_shape=(jax.ShapeDtypeStruct((B, Cqp, N), bf16),
                   jax.ShapeDtypeStruct((B, C, N), bf16)),
        grid=(B, ntp),
        in_specs=[
            pl.BlockSpec((1, C, tp), lambda b, ni: (b, 0, ni)),     # x tile
            pl.BlockSpec((Cqp, C), lambda b, ni: (0, 0)),           # Wk^T (padded)
            pl.BlockSpec((Cqp, 1), lambda b, ni: (0, 0)),           # bk
            pl.BlockSpec((C, C), lambda b, ni: (0, 0)),             # Wv^T
            pl.BlockSpec((C, 1), lambda b, ni: (0, 0)),             # bv
        ],
        out_specs=(
            pl.BlockSpec((1, Cqp, tp), lambda b, ni: (b, 0, ni)),   # K (bf16)
            pl.BlockSpec((1, C, tp), lambda b, ni: (b, 0, ni)),     # V (bf16)
        ),
        compiler_params=pltpu.CompilerParams(
            dimension_semantics=("parallel", "parallel")),
    )(x_bcn, wk_t, bk_col, wv_t, bv_col)

    # --- 2) Flash-style attention + gamma residual over (B, q-tiles, kv-tiles). ---
    # NOTE: if the bf16 K/V DMA stream is ever exposed at small C, the K/V specs can
    # take pipeline_mode=pl.Buffered(3); double buffering suffices at these tiles.
    out_bcn = pl.pallas_call(
        _attn_kernel,
        out_shape=jax.ShapeDtypeStruct((B, C, N), f32),
        grid=(B, nq, nk),
        in_specs=[
            pl.BlockSpec(memory_space=pltpu.SMEM),                      # gamma (1,)
            pl.BlockSpec((1, C, tq), lambda b, qi, ki: (b, 0, qi)),     # x (q rows + residual)
            pl.BlockSpec((1, Cqp, tk), lambda b, qi, ki: (b, 0, ki)),   # K
            pl.BlockSpec((1, C, tk), lambda b, qi, ki: (b, 0, ki)),     # V
            pl.BlockSpec((Cqp, C), lambda b, qi, ki: (0, 0)),           # Wq^T (padded)
            pl.BlockSpec((Cqp, 1), lambda b, qi, ki: (0, 0)),           # bq
        ],
        out_specs=pl.BlockSpec((1, C, tq), lambda b, qi, ki: (b, 0, qi)),
        scratch_shapes=[
            pltpu.VMEM((Cqp, tq), bf16),     # cached q tile (bf16 MXU operand)
            pltpu.VMEM((1, tq), f32),        # running max
            pltpu.VMEM((1, tq), f32),        # running sum
            pltpu.VMEM((C, tq), f32),        # output accumulator (C, TQ)
        ],
        compiler_params=pltpu.CompilerParams(
            dimension_semantics=("parallel", "parallel", "arbitrary")),
    )(params["gamma"], x_bcn, k_bcn, v_bcn, wq_t, bq_col)

    return out_bcn.reshape(B, C, H, W)


# --------------------------------- reference ----------------------------------

def _reference(x_nchw, params):
    """Pure-JAX float32 reference mirroring the PyTorch forward."""
    B, C, H, W = x_nchw.shape
    N = H * W
    x = x_nchw.reshape(B, C, N)
    q = jnp.einsum("bcn,cd->bnd", x, params["wq"]) + params["bq"]     # (B, N, C//8)
    k = jnp.einsum("bcn,cd->bnd", x, params["wk"]) + params["bk"]     # (B, N, C//8)
    v = jnp.einsum("bcn,cd->bnd", x, params["wv"]) + params["bv"]     # (B, N, C)
    att = jax.nn.softmax(jnp.einsum("bnd,bmd->bnm", q, k), axis=-1)   # (B, N, N)
    out = jnp.einsum("bnm,bmd->bnd", att, v)                          # (B, N, C)
    out = jnp.swapaxes(out, 1, 2).reshape(B, C, H, W)
    return x_nchw + params["gamma"][0] * out


def init_params(key, C):
    Cq = C // 8
    k1, k2, k3, k4, k5, k6 = jax.random.split(key, 6)
    scale = 0.1
    return {
        # 1x1-conv weights stored as (in_C, out_C) matrices (== torch weight.squeeze().T)
        "wq": scale * jax.random.normal(k1, (C, Cq), jnp.float32),
        "bq": scale * jax.random.normal(k2, (Cq,), jnp.float32),
        "wk": scale * jax.random.normal(k3, (C, Cq), jnp.float32),
        "bk": scale * jax.random.normal(k4, (Cq,), jnp.float32),
        "wv": scale * jax.random.normal(k5, (C, C), jnp.float32),
        "bv": scale * jax.random.normal(k6, (C,), jnp.float32),
        # nn.Parameter(torch.zeros(1)); set nonzero so the attention path is exercised
        "gamma": jnp.full((1,), 0.5, jnp.float32),
    }


if __name__ == "__main__":
    B, C, H, W = 2, 32, 16, 16        # N = 256
    key = jax.random.PRNGKey(0)
    kx, kp = jax.random.split(key)
    x = jax.random.normal(kx, (B, C, H, W), jnp.float32)
    params = init_params(kp, C)

    # tq=tk=128 at N=256 gives an attention grid of (2, 2, 2), exercising the
    # multi-step online-softmax accumulation path even at this small test size.
    y = self_attention_pallas(x, params, tq=128, tk=128, tproj=128)
    jax.block_until_ready(y)

    y_ref = _reference(x, params)
    # bf16 MXU operands (f32 accumulation) -> compare with a correspondingly loose tolerance.
    err = float(jnp.max(jnp.abs(y - y_ref)))
    assert jnp.allclose(y, y_ref, atol=5e-2, rtol=5e-2), f"mismatch vs reference, max abs err={err}"
    print("KERNEL_OK")
</pallas_src>

<mosaic_0001>
module attributes {stable_mosaic.version = 11 : i64} {
  func.func @_kv_proj_kernel(%arg0: i32, %arg1: i32, %arg2: memref<1x32x128xf32, #tpu.memory_space<vmem>>, %arg3: memref<16x32xbf16, #tpu.memory_space<vmem>>, %arg4: memref<16x1xf32, #tpu.memory_space<vmem>>, %arg5: memref<32x32xbf16, #tpu.memory_space<vmem>>, %arg6: memref<32x1xf32, #tpu.memory_space<vmem>>, %arg7: memref<1x16x128xbf16, #tpu.memory_space<vmem>>, %arg8: memref<1x32x128xbf16, #tpu.memory_space<vmem>>) attributes {dimension_semantics = [#tpu.dimension_semantics<parallel>, #tpu.dimension_semantics<parallel>], iteration_bounds = array<i64: 2, 2>, scalar_prefetch = 0 : i64, scratch_operands = 0 : i64, tpu.core_type = #tpu.core_type<tc>, window_params = [{transform_indices = @transform_0, window_bounds = array<i64: 1, 32, 128>}, {pipeline_mode = #tpu.pipeline_mode<synchronous>, transform_indices = @transform_1, window_bounds = array<i64: 16, 32>}, {pipeline_mode = #tpu.pipeline_mode<synchronous>, transform_indices = @transform_2, window_bounds = array<i64: 16, 1>}, {pipeline_mode = #tpu.pipeline_mode<synchronous>, transform_indices = @transform_3, window_bounds = array<i64: 32, 32>}, {pipeline_mode = #tpu.pipeline_mode<synchronous>, transform_indices = @transform_4, window_bounds = array<i64: 32, 1>}, {transform_indices = @transform_5, window_bounds = array<i64: 1, 16, 128>}, {transform_indices = @transform_6, window_bounds = array<i64: 1, 32, 128>}]} {
    %c0 = arith.constant 0 : index
    %c0_0 = arith.constant 0 : index
    %c0_1 = arith.constant 0 : index
    %0 = vector.load %arg2[%c0, %c0_0, %c0_1] : memref<1x32x128xf32, #tpu.memory_space<vmem>>, vector<1x32x128xf32>
    %1 = vector.shape_cast %0 : vector<1x32x128xf32> to vector<32x128xf32>
    %2 = arith.truncf %1 : vector<32x128xf32> to vector<32x128xbf16>
    %c0_2 = arith.constant 0 : index
    %c0_3 = arith.constant 0 : index
    %3 = vector.load %arg3[%c0_2, %c0_3] : memref<16x32xbf16, #tpu.memory_space<vmem>>, vector<16x32xbf16>
    %cst = arith.constant dense<0.000000e+00> : vector<16x128xf32>
    %4 = tpu.matmul %3, %2, %cst {dimension_numbers = #tpu.dot_dimension_numbers<[1], [0], [0], [1], [0, 0, 1, 1], [], []>} : vector<16x32xbf16>, vector<32x128xbf16>, vector<16x128xf32> -> vector<16x128xf32>
    %c0_4 = arith.constant 0 : index
    %c0_5 = arith.constant 0 : index
    %5 = vector.load %arg4[%c0_4, %c0_5] : memref<16x1xf32, #tpu.memory_space<vmem>>, vector<16x1xf32>
    %6 = vector.broadcast %5 : vector<16x1xf32> to vector<16x128xf32>
    %7 = arith.addf %4, %6 : vector<16x128xf32>
    %c0_6 = arith.constant 0 : index
    %c0_7 = arith.constant 0 : index
    %8 = vector.load %arg5[%c0_6, %c0_7] : memref<32x32xbf16, #tpu.memory_space<vmem>>, vector<32x32xbf16>
    %cst_8 = arith.constant dense<0.000000e+00> : vector<32x128xf32>
    %9 = tpu.matmul %8, %2, %cst_8 {dimension_numbers = #tpu.dot_dimension_numbers<[1], [0], [0], [1], [0, 0, 1, 1], [], []>} : vector<32x32xbf16>, vector<32x128xbf16>, vector<32x128xf32> -> vector<32x128xf32>
    %c0_9 = arith.constant 0 : index
    %c0_10 = arith.constant 0 : index
    %10 = vector.load %arg6[%c0_9, %c0_10] : memref<32x1xf32, #tpu.memory_space<vmem>>, vector<32x1xf32>
    %11 = vector.broadcast %10 : vector<32x1xf32> to vector<32x128xf32>
    %12 = arith.addf %9, %11 : vector<32x128xf32>
    %13 = arith.truncf %7 : vector<16x128xf32> to vector<16x128xbf16>
    %c0_11 = arith.constant 0 : index
    %c0_12 = arith.constant 0 : index
    %c0_13 = arith.constant 0 : index
    %14 = vector.load %arg7[%c0_11, %c0_12, %c0_13] : memref<1x16x128xbf16, #tpu.memory_space<vmem>>, vector<1x16x128xbf16>
    %15 = vector.shape_cast %14 : vector<1x16x128xbf16> to vector<16x128xbf16>
    %16 = vector.shape_cast %13 : vector<16x128xbf16> to vector<1x16x128xbf16>
    tpu.vector_store %arg7[%c0_11, %c0_12, %c0_13], %16 {strides = array<i32>} : memref<1x16x128xbf16, #tpu.memory_space<vmem>>, vector<1x16x128xbf16>,
    %17 = arith.truncf %12 : vector<32x128xf32> to vector<32x128xbf16>
    %c0_14 = arith.constant 0 : index
    %c0_15 = arith.constant 0 : index
    %c0_16 = arith.constant 0 : index
    %18 = vector.load %arg8[%c0_14, %c0_15, %c0_16] : memref<1x32x128xbf16, #tpu.memory_space<vmem>>, vector<1x32x128xbf16>
    %19 = vector.shape_cast %18 : vector<1x32x128xbf16> to vector<32x128xbf16>
    %20 = vector.shape_cast %17 : vector<32x128xbf16> to vector<1x32x128xbf16>
    tpu.vector_store %arg8[%c0_14, %c0_15, %c0_16], %20 {strides = array<i32>} : memref<1x32x128xbf16, #tpu.memory_space<vmem>>, vector<1x32x128xbf16>,
    return
  }
  func.func @transform_0(%arg0: i32, %arg1: i32) -> (i32, i32, i32) {
    %c0_i32 = arith.constant 0 : i32
    %c0_i32_0 = arith.constant 0 : i32
    return %arg0, %c0_i32, %arg1 : i32, i32, i32
  }
  func.func @transform_1(%arg0: i32, %arg1: i32) -> (i32, i32) {
    %c0_i32 = arith.constant 0 : i32
    %c0_i32_0 = arith.constant 0 : i32
    %c0_i32_1 = arith.constant 0 : i32
    return %c0_i32, %c0_i32_0 : i32, i32
  }
  func.func @transform_2(%arg0: i32, %arg1: i32) -> (i32, i32) {
    %c0_i32 = arith.constant 0 : i32
    %c0_i32_0 = arith.constant 0 : i32
    %c0_i32_1 = arith.constant 0 : i32
    return %c0_i32, %c0_i32_0 : i32, i32
  }
  func.func @transform_3(%arg0: i32, %arg1: i32) -> (i32, i32) {
    %c0_i32 = arith.constant 0 : i32
    %c0_i32_0 = arith.constant 0 : i32
    %c0_i32_1 = arith.constant 0 : i32
    return %c0_i32, %c0_i32_0 : i32, i32
  }
  func.func @transform_4(%arg0: i32, %arg1: i32) -> (i32, i32) {
    %c0_i32 = arith.constant 0 : i32
    %c0_i32_0 = arith.constant 0 : i32
    %c0_i32_1 = arith.constant 0 : i32
    return %c0_i32, %c0_i32_0 : i32, i32
  }
  func.func @transform_5(%arg0: i32, %arg1: i32) -> (i32, i32, i32) {
    %c0_i32 = arith.constant 0 : i32
    %c0_i32_0 = arith.constant 0 : i32
    return %arg0, %c0_i32, %arg1 : i32, i32, i32
  }
  func.func @transform_6(%arg0: i32, %arg1: i32) -> (i32, i32, i32) {
    %c0_i32 = arith.constant 0 : i32
    %c0_i32_0 = arith.constant 0 : i32
    return %arg0, %c0_i32, %arg1 : i32, i32, i32
  }
}

</mosaic_0001>

<bundles_post_ra>
// kernel: tpu_custom_call.1
= control target key start
LH: loop header
LB: loop body
LE: loop exit
PB: predicated region body
PF: predicated region fallthrough
CT: control target
= control target key end

     0   :  { %12 = vsyncpa [#allocation3], 0  ;;  %s1129_s0 = inlined_call_operand.hbm [shape: f32[2,32,256], index: 0, kind: input, shape index: {}]   ;;  %s1130_s1 = inlined_call_operand.vmem [shape: bf16[16,32], index: 1, kind: input, shape index: {}]   ;;  %s1131_s2 = inlined_call_operand.vmem [shape: f32[16,1], index: 2, kind: input, shape index: {}]   ;;  %s1132_s3 = inlined_call_operand.vmem [shape: bf16[32,32], index: 3, kind: input, shape index: {}]   ;;  %s1133_s4 = inlined_call_operand.vmem [shape: f32[32,1], index: 4, kind: input, shape index: {}]   ;;  %s1134_s5 = inlined_call_operand.hbm [shape: bf16[2,16,256], index: 5, kind: output, shape index: {0}]   ;;  %s1135_s6 = inlined_call_operand.hbm [shape: bf16[2,32,256], index: 6, kind: output, shape index: {1}]  }
   0x1   :  { %14 = vsyncpa [#allocation3 + $0x1], 0 }
   0x2   :  { %15 = vsyncpa [#allocation4], 0 }
   0x3   :  { %17 = vsyncpa [#allocation4 + $0x1], 0 }
   0x4   :  { %18 = vsyncpa [#allocation7], 0 }
   0x5   :  { %20 = vsyncpa [#allocation7 + $0x1], 0  ;;  %s936_s21 = smov 0   ;;  %s938_s22 = smov 0  }
   0x6   :  { %s940_s23 = smov 0   ;;  %s942_s24 = smov 0  }
   0x7   :  { %s944_s25 = smov 0   ;;  %s946_s26 = smov 0  }
   0x8   :  { %s948_s27 = smov 0   ;;  %s950_s28 = smov 0  }
   0x9 LB: > { %1141 = sst [smem:[#allocation11_spill]] %s864_s21  ;;  %s584_s29 = sadd.s32 4294967295, %s892_s28   ;;  %s892_s28 = sphi %s950_s28, %s26_s28   ;;  %s888_s27 = sphi %s948_s27, %s1162_s27   ;;  %s884_s26 = sphi %s946_s26, %s1161_s26   ;;  %s880_s25 = sphi %s944_s25, %s1160_s25   ;;  %s876_s24 = sphi %s942_s24, %s1159_s24   ;;  %s872_s23 = sphi %s940_s23, %s1154_s23   ;;  %s868_s22 = sphi %s938_s22, %s1158_s22   ;;  %s864_s21 = sphi %s936_s21, %s1157_s21  }
   0xa   : > { %1142 = sst [smem:[#allocation12_spill]] %s872_s23  ;;  %s585_s30 = sadd.s32 4294967294, %s892_s28  }
   0xb   : > { %s35_s7 = sadd.s32 1, %s884_s26  ;;  %s38_s8 = sadd.s32 1, %s888_s27 }
   0xc   : > { %p36_p0 = scmp.ge.s32.totalorder %s35_s7, 2  ;;  %s47_s9 = sadd.s32 1, %s872_s23 }
   0xd   : > { %p54_p1 = scmp.ne.s32.totalorder %s872_s23, %s868_s22  ;;  %p55_p2 = scmp.eq.s32.totalorder %s892_s28, 0 }
   0xe   : > { %s1164_s7 = smov (%p36_p0, %s35_s7), 0  ;;  %s1166_s8 = smov (!%p36_p0, %s38_s8), %s888_s27 }
   0xf   : > { %1143 = sst [smem:[#allocation13_spill]] %s1164_s7  ;;  %s43_s10 = ssub.s32 %s884_s26, %s1164_s7 }
  0x10   : > { %p989_p3 = por %p55_p2, %p54_p1  ;;  %p40_p4 = scmp.ge.s32.totalorder %s1166_s8, 2 }
  0x11   : > { %p60_p5 = scmp.ne.s32.totalorder %s868_s22, %s864_s21  ;;  %p61_p6 = scmp.eq.s32.totalorder %s584_s29, 0 }
  0x12   : > { %p170_p7 = scmp.eq.s32.totalorder %s584_s29, 3  ;;  %s1168_s8 = smov (%p40_p4, %s1166_s8), 0 }
  0x13   : > { %1145 = sst [smem:[#allocation14_spill]] %s1168_s8  ;;  %p997_p8 = por %p61_p6, %p60_p5 }
  0x14   : > { %p1001_p9 = por %p170_p7, %p54_p1  ;;  %s42_s14 = ssub.s32 %s888_s27, %s1168_s8 }
  0x15   : > { %p176_p10 = scmp.eq.s32.totalorder %s585_s30, 3  ;;  %s44_s15 = sor.u32 %s43_s10, %s42_s14 }
  0x16   : > { %p45_p11 = scmp.eq.s32.totalorder %s44_s15, 0  ;;  %p656_p13 = scmp.lt.s32.totalorder %s892_s28, 4 }
  0x17   : > { %p1007_p12 = por %p176_p10, %p60_p5  ;;  %s236_s17 = sand.u32 1, %s872_s23  }
  0x18   : > { %s1014_s18 = scalar_select %p45_p11, %s872_s23, %s47_s9  }
  0x19   : > { %s1148_s16 = scalar_select %p1007_p12, 1, 0 }
  0x1a   : > { %1150 = sst [smem:[#allocation16_spill]] %s1014_s18  ;;  %s588_s19 = sshll.u32 %s236_s17, 5 }
  0x1b   : > { %1149 = sst [smem:[#allocation15_spill]] %s1148_s16  ;;  %s589_s20 = sshll.u32 %s888_s27, 3 }
  0x1c   : > { %s244_s29 = sadd.s32 %s884_s26, %s589_s20  ;;  %s240_s7 = scalar_lea.vmem [#allocation2], %s588_s19 }
  0x1d   : > { %s249_s21 = sshll.u32 %s240_s7, 4  ;;  %s590_s8 = sshll.u32 %s244_s29, 3  ;;  %s250_s21 = int_to_ptr.vmem [resolvable:$true] %s249_s21 }
  0x1e   : > { %s246_s14 = scalar_lea.hbm %s1129_s0, %s590_s8  ;;  %p646_p0 = pnand %p656_p13, %p989_p3 }
  0x1f   : > { %s247_s15 = sshll.u32 %s246_s14, 4  ;;  %s237_s16 = scalar_lea.sflag [#allocation3], %s236_s17  ;;  %s248_s15 = int_to_ptr.hbm [resolvable:$true] %s247_s15 }
  0x20   : > { %s894_s9 = smov 256   ;;  %s895_s18 = smov 128  }
  0x21   : > { %s896_s23 = smov 8   ;;  %p591_p1 = scmp.ge.s32.totalorder %s892_s28, 1 }
  0x22   : > { %648 = dma.hbm_to_vmem [thread:$0]  (!%p646_p0), %s248_s15, 512, %s250_s21, %s237_s16, %s894_s9, %s895_s18, %s896_s23  }
  0x23   : > { %p257_p2 = scmp.lt.s32.totalorder %s892_s28, 5 }
  0x25   : > { %p258_p4 = pnand %p591_p1, %p257_p2 }
  0x26   : > { %s1026_s7 = sand.u32 (!%p258_p4), 1, %s868_s22  }
  0x27   : > { %261 = sbr.rel (%p258_p4) target bundleno = 212 (0xd4), region = 40  ;;  %s592_s8 = sshll.u32 (!%p258_p4), %s1026_s7, 5 }
  0x28   : > { %s264_s11 = scalar_lea.sflag (!%p258_p4), [#allocation3], %s1026_s7  ;;  %s267_s19 = scalar_lea.vmem (!%p258_p4), [#allocation2], %s592_s8 }
  0x2c   : > { %851 = dma.done.wait (%p997_p8), %s264_s11, 512  }
  0x2d   : > { %853 = vsyncadd (%p997_p8), %s264_s11, 4294966784  ;;  %v897_v0 = vmov 0   ;;  %v305_v1 = vld [vmem:[%s267_s19 + $0x10] sm:$0xff]  ;;  %v306_v2 = vld [vmem:[%s267_s19 + $0x18] sm:$0xff]  ;;  %vm328_vm0 = vcmask 261120   ;;  %s612_s16 = sshll.u32 %s880_s25, 2 }
  0x2e   : > { %730 = vset.pattern.permute.xlu1 %v897_v0  ;;  %729 = vset.pattern.permute.xlu0 %v897_v0  ;;  %v303_v3 = vld [vmem:[%s267_s19] sm:$0xff]  ;;  %v308_v4 = vpack.c.bf16 %v306_v2, %v305_v1  ;;  %v304_v5 = vld [vmem:[%s267_s19 + $0x8] sm:$0xff]  ;;  %v352_v9 = vld [vmem:[%s1133_s4 + $0x10] sm:$0xff]  ;;  %s437_s17 = sadd.s32 %s876_s24, %s612_s16  ;;  %s614_s12 = sshll.u32 %s880_s25, 3 }
  0x2f   : > { %731 = vset.pattern.permute.xlu2 %v897_v0  ;;  %v350_v6 = vld [vmem:[%s1133_s4] sm:$0xff]  ;;  %v307_v8 = vpack.c.bf16 %v304_v5, %v303_v3  ;;  %v620_v12 = vld [vmem:[%s1132_s3 + $0x8] sm:$0xff]  ;;  %v353_v15 = vld [vmem:[%s1133_s4 + $0x18] sm:$0xff]  ;;  %s593_s18 = sshll.u32 %s1026_s7, 3  ;;  %s613_s20 = sshll.u32 %s437_s17, 2 }
  0x30   : > { %v311_v7 = vld [vmem:[%s1131_s2] sm:$0xff]  ;;  %338 = vmatpush.bf16.msra.mxu0 %v308_v4  ;;  %396 = vmatpush.bf16.msra.mxu1 %v308_v4  ;;  %v351_v13 = vld [vmem:[%s1133_s4 + $0x8] sm:$0xff]  ;;  %s455_s29 = sadd.s32 %s876_s24, %s614_s12  ;;  %s439_s14 = scalar_lea.hbm %s1134_s5, %s613_s20 }
  0x31   : > { %637 = vmatpush.bf16.msra.mxu2 %v308_v4  ;;  %356 = vperm.xlu1 %730, %v350_v6   ;;  %v618_v10 = vld [vmem:[%s1130_s1] sm:$0xff]  ;;  %v312_v14 = vld [vmem:[%s1131_s2 + $0x8] sm:$0xff]  ;;  %s294_s15 = scalar_lea.vmem [#allocation5], %s593_s18  ;;  %s594_s8 = sshll.u32 %s1026_s7, 4 }
  0x32   : > { %315 = vperm.xlu0 %729, %v311_v7   ;;  %366 = vperm.xlu2 %731, %v352_v9   ;;  %v619_v11 = vld [vmem:[%s1132_s3] sm:$0xff]  ;;  %s440_s9 = sshll.u32 %s294_s15, 4  ;;  %s615_s11 = sshll.u32 %s455_s29, 2  ;;  %s1070_s9 = int_to_ptr.vmem [resolvable:$true] %s440_s9 }
  0x33   : > { %s442_s19 = sshll.u32 %s439_s14, 4  ;;  %s1075_s21 = scalar_lea.hbm %s1135_s6, %s615_s11  ;;  %s443_s19 = int_to_ptr.hbm [resolvable:$true] %s442_s19 }
  0x34   : > { %339 = vmatpush.bf16.msra.mxu0 %v307_v8  ;;  %397 = vmatpush.bf16.msra.mxu1 %v307_v8  ;;  %s301_s23 = scalar_lea.vmem [#allocation6], %s594_s8  ;;  %s460_s17 = sshll.u32 %s1075_s21, 4  ;;  %s461_s17 = int_to_ptr.hbm [resolvable:$true] %s460_s17 }
  0x35   : > { %638 = vmatpush.bf16.msra.mxu2 %v307_v8  ;;  %s458_s16 = sshll.u32 %s301_s23, 4  ;;  %s422_s12 = scalar_lea.sflag [#allocation4], %s1026_s7  ;;  %s459_s16 = int_to_ptr.vmem [resolvable:$true] %s458_s16 }
  0x36   : > { %s776_s18 = sshra.s32 %s443_s19, 4  ;;  %s782_s10 = scalar_lea.hbm %s1134_s5, 32  ;;  %s777_s18 = int_to_ptr.hbm [resolvable:$true] %s776_s18 }
  0x37   : > { %599 = vmatmul.msk.bf16.vlgmr.msra.gmra.mxu0 %vm328_vm0, %v618_v10  ;;  %608 = vmatmul.msk.bf16.vlgmr.msra.gmra.mxu1 %vm328_vm0, %v619_v11  ;;  %s778_s20 = scalar_lea.hbm %s777_s18, 8  ;;  %p783_p7 = scmp.lt.s32.totalorder %s777_s18, %s1134_s5 }
  0x38   : > { %609 = vmatmul.msk.bf16.vlgmr.msra.gmra.mxu2 %vm328_vm0, %v620_v12  ;;  %p779_p3 = scmp.ne.s32.totalorder %s777_s18, %s778_s20  ;;  %p784_p8 = scmp.lt.s32.totalorder %s782_s10, %s778_s20 }
  0x39   : > { %361 = vperm.xlu1 %730, %v351_v13  }
  0x3a   : > { %320 = vperm.xlu0 %729, %v312_v14   ;;  %371 = vperm.xlu2 %731, %v353_v15   ;;  %p780_p5 = pnand %p779_p3, %p1001_p9  ;;  %p785_p10 = por %p784_p8, %p783_p7 }
  0x3c   : > { %p781_p6 = pneg %p780_p5 }
  0x3e   : > { %p786_p11 = pnand %p785_p10, %p781_p6 }
  0x8c   : > { %v367_v20 = vpop.permute.xlu2 %366 }
  0x94   : > { %v372_v32 = vpop.permute.xlu2 %371 }
  0xa3   : > { %v357_v16 = vpop.permute.xlu1 %356 }
  0xa4   : > { %v316_v17 = vpop.permute.xlu0 %315 }
  0xab   : > { %v362_v21 = vpop.permute.xlu1 %361 }
  0xac   : > { %v321_v22 = vpop.permute.xlu0 %320 }
  0xb4   : > { %v341_v18 = vpop.f32.mrf.mxu0  ;;  %v399_v19 = vpop.f32.mrf.mxu1 }
  0xb5   : > { %v342_v26 = vadd.f32 %v341_v18, %v316_v17  ;;  %v400_v27 = vadd.f32 %v399_v19, %v357_v16 }
  0xbb   : > { %v404_v23 = vpop.f32.mrf.mxu2 }
  0xbc   : > { %v343_v24 = vpop.f32.mrf.mxu0  ;;  %v401_v25 = vpop.f32.mrf.mxu1 }
  0xbd   : > { %v344_v28 = vadd.f32 %v343_v24, %v321_v22  ;;  %v402_v29 = vadd.f32 %v401_v25, %v362_v21 }
  0xbf   : > { %v624_v30 = vpack.c.bf16 %v344_v28, %v342_v26  ;;  %v629_v31 = vpack.c.bf16 %v402_v29, %v400_v27 }
  0xc1   : > { %625 = vst [vmem:[%s294_s15] sm:$0xff] %v624_v30  }
  0xc2   : > { %630 = vst [vmem:[%s301_s23] sm:$0xff] %v629_v31  }
  0xc3   : > { %v406_v33 = vpop.f32.mrf.mxu2 }
  0xc4   : > { %789 = shalt.err (!%p786_p11)
}
  0xc5   : > { %s898_s8 = smov 64   ;;  %s899_s11 = smov 128   ;;  %v405_v34 = vadd.f32 %v404_v23, %v367_v20  ;;  %v407_v35 = vadd.f32 %v406_v33, %v372_v32 }
  0xc6   : > { %s900_s24 = smov 4   ;;  %s427_s25 = scalar_lea.sflag [#allocation7], %s1026_s7 }
  0xc7   : > { %641 = dma.vmem_to_hbm [thread:$0]  (%p1001_p9), %s1070_s9, 128, %s443_s19, %s422_s12, %s898_s8, %s899_s11, %s900_s24   ;;  %v634_v36 = vpack.c.bf16 %v407_v35, %v405_v34 }
  0xc8   : > { %s804_s21 = sshra.s32 %s461_s17, 4  ;;  %s810_s30 = scalar_lea.hbm %s1135_s6, 64  ;;  %s805_s21 = int_to_ptr.hbm [resolvable:$true] %s804_s21 }
  0xc9   : > { %636 = vst [vmem:[%s301_s23 + $0x8] sm:$0xff] %v634_v36   ;;  %s806_s18 = scalar_lea.hbm %s805_s21, 16  ;;  %p811_p2 = scmp.lt.s32.totalorder %s805_s21, %s1135_s6 }
  0xca   : > { %p807_p13 = scmp.ne.s32.totalorder %s805_s21, %s806_s18  ;;  %p812_p4 = scmp.lt.s32.totalorder %s810_s30, %s806_s18 }
  0xcc   : > { %p808_p0 = pnand %p807_p13, %p1001_p9  ;;  %p813_p3 = por %p812_p4, %p811_p2 }
  0xce   : > { %p809_p1 = pneg %p808_p0 }
  0xd0   : > { %p814_p5 = pnand %p813_p3, %p809_p1 }
  0xd2   : > { %817 = shalt.err (!%p814_p5)
}
  0xd3   : > { %642 = dma.vmem_to_hbm [thread:$0]  (%p1001_p9), %s459_s16, 256, %s461_s17, %s427_s25, %s898_s8, %s899_s11, %s900_s24  }
  0xd4 PF: > { %s1151_s7 = sld [smem:[#allocation11_spill]]  ;;  %p657_p6 = scmp.ge.s32.totalorder %s892_s28, 2 }
  0xd6   : > { %p650_p7 = pnand %p657_p6, %p1007_p12 }
  0xd8   : > { %p651_p8 = pneg %p650_p7 }
  0xda   : > { %s475_s23 = sand.u32 1, %s1151_s7  }
  0xdb   : > { %s476_s12 = scalar_lea.sflag [#allocation4], %s475_s23 }
  0xdc   : > { %855 = dma.done.wait (%p651_p8), %s476_s12, 128  }
  0xdd   : > { %857 = vsyncadd (%p651_p8), %s476_s12, 4294967168  ;;  %s486_s14 = scalar_lea.sflag [#allocation7], %s475_s23 }
  0xde   : > { %859 = dma.done.wait (%p651_p8), %s486_s14, 256  }
  0xdf   : > { %861 = vsyncadd (%p651_p8), %s486_s14, 4294967040  ;;  %s26_s28 = sadd.s32 1, %s892_s28   ;;  %s1153_s13 = sld [smem:[#allocation12_spill]] }
  0xe0   : > { %p23_p10 = scmp.ge.s32.totalorder %s26_s28, 6   ;;  %s1154_s23 = sld [smem:[#allocation16_spill]] }
  0xe1   : > { %s1155_s16 = sld [smem:[#allocation13_spill]]  ;;  %s1157_s21 = smov %s868_s22 }
  0xe2   : > { %s1156_s17 = sld [smem:[#allocation14_spill]]  ;;  %s1159_s24 = smov %s884_s26 }
  0xe3   : > { %s1160_s25 = smov %s888_s27 }
  0xe4   :  { %25 = sbr.rel (!%p23_p10) target bundleno = 9 (0x9), region = 102 }
  0xe5   : > { %s1158_s22 = smov %s1153_s13 }
  0xe7   : > { %s1161_s26 = smov %s1155_s16 }
  0xe8   : > { %s1162_s27 = smov %s1156_s17 }
  0xe9   :  { %492 = vsyncpa [#allocation3], 1 }
  0xea   :  { %494 = vsyncpa [#allocation3 + $0x1], 1 }
  0xeb   :  { %495 = vsyncpa [#allocation4], 1 }
  0xec   :  { %497 = vsyncpa [#allocation4 + $0x1], 1 }
  0xed   :  { %498 = vsyncpa [#allocation7], 1 }
  0xee   :  { %500 = vsyncpa [#allocation7 + $0x1], 1 }

</bundles_post_ra>
